<compile_context>
chip_gen: v5e
topology: v5e:2x2
jax: 0.10.0
libtpu: 0.0.40
codegen_flags: <defaults>
</compile_context>

<pallas_src>
import jax
import jax.numpy as jnp
from jax.experimental import pallas as pl
from jax.experimental.pallas import tpu as pltpu


def _acceptor_kernel(ids_ref,    # (S,)     int32  SMEM  token ids
                     xw_ref,     # (V, 4H)  f32    VMEM  emb@W_ih.T + b  (g cols x2)
                     w_hh_ref,   # (H, 4H)  f32    VMEM  W_hh.T          (g cols x2)
                     w1_ref,     # (H, M)   f32    VMEM  fc1 weight (pre-transposed)
                     b1_ref,     # (1, M)   f32
                     w2_ref,     # (M, T)   f32    VMEM  hidden2tag weight (pre-transposed)
                     b2_ref,     # (1, T)   f32
                     out_ref):   # (1, T)   f32
    seq_len = ids_ref.shape[0]
    hidden = w_hh_ref.shape[0]

    # 1) Fused gather: per-token rows of the precomputed input-projection table.
    #    Rows are (1, 4H) = lane-dense and stay vreg-resident (no VMEM scratch).
    xw = [xw_ref[pl.ds(ids_ref[t], 1), :] for t in range(seq_len)]

    # 2) LSTM recurrence, fully unrolled; h/c carried as vreg values.
    w_hh = w_hh_ref[...]                                     # (H, 4H), read once
    h = jnp.zeros((1, hidden), jnp.float32)                  # matches init_hidden
    c = jnp.zeros((1, hidden), jnp.float32)
    for t in range(seq_len):
        gates = xw[t] + jnp.dot(h, w_hh, preferred_element_type=jnp.float32)  # (1, 4H)
        sig = jax.nn.sigmoid(gates)                          # single full-width EUP push
        # PyTorch LSTM gate order: input, forget, cell(g), output.
        i_g = sig[:, 0 * hidden:1 * hidden]
        f_g = sig[:, 1 * hidden:2 * hidden]
        g_g = 2.0 * sig[:, 2 * hidden:3 * hidden] - 1.0      # tanh(x) = 2*sigmoid(2x) - 1
        o_g = sig[:, 3 * hidden:4 * hidden]
        c = f_g * c + i_g * g_g
        h = o_g * jnp.tanh(c)

    # 3) MLP head on the last hidden state + numerically stable log_softmax.
    z1 = jnp.tanh(jnp.dot(h, w1_ref[...],
                          preferred_element_type=jnp.float32) + b1_ref[...])
    logits = jnp.dot(z1, w2_ref[...],
                     preferred_element_type=jnp.float32) + b2_ref[...]
    m = jnp.max(logits, axis=-1, keepdims=True)
    shifted = logits - m
    lse = jnp.log(jnp.sum(jnp.exp(shifted), axis=-1, keepdims=True))
    out_ref[...] = shifted - lse


def acceptor_forward(sentence, params):
    """sentence: int32 array of shape (1, seq_len); returns (1, tagset_size) log-probs."""
    emb = params["embedding"]                                 # (V, E)
    H = params["w_hh"].shape[1]

    ids = jnp.clip(sentence.reshape(-1).astype(jnp.int32), 0, emb.shape[0] - 1)

    # Fold embedding + input projection + summed biases into one (V, 4H) table.
    xw_table = emb @ params["w_ih"].T + (params["b_ih"] + params["b_hh"])[None, :]
    w_hh_t = params["w_hh"].T                                 # (H, 4H)

    # Pre-scale the cell(g)-gate columns by 2 so the kernel can use
    # tanh(x) = 2*sigmoid(2x) - 1 (exact rescale; removes one EUP push/step).
    g_scale = jnp.ones((4 * H,), jnp.float32).at[2 * H:3 * H].set(2.0)
    xw_table = xw_table * g_scale[None, :]
    w_hh_t = w_hh_t * g_scale[None, :]

    w1_t = params["w1"].T                                     # (H, M)
    b1 = params["b1"][None, :]                                # (1, M)
    w2_t = params["w2"].T                                     # (M, T)
    b2 = params["b2"][None, :]                                # (1, T)
    tagset_size = w2_t.shape[1]

    smem = pl.BlockSpec(memory_space=pltpu.MemorySpace.SMEM)
    vmem = pl.BlockSpec(memory_space=pltpu.MemorySpace.VMEM)

    return pl.pallas_call(
        _acceptor_kernel,
        out_shape=jax.ShapeDtypeStruct((1, tagset_size), jnp.float32),
        in_specs=[smem] + [vmem] * 6,
        out_specs=vmem,
    )(ids, xw_table, w_hh_t, w1_t, b1, w2_t, b2)


def _reference_forward(sentence, params):
    """Pure-JAX reference matching the PyTorch forward semantics."""
    embeds = jnp.take(params["embedding"], sentence[0], axis=0)  # (S, E)
    H = params["w_hh"].shape[1]
    h = jnp.zeros((1, H), jnp.float32)
    c = jnp.zeros((1, H), jnp.float32)
    for t in range(embeds.shape[0]):
        x = embeds[t:t + 1]
        gates = (x @ params["w_ih"].T + h @ params["w_hh"].T
                 + params["b_ih"] + params["b_hh"])
        i = jax.nn.sigmoid(gates[:, 0 * H:1 * H])
        f = jax.nn.sigmoid(gates[:, 1 * H:2 * H])
        g = jnp.tanh(gates[:, 2 * H:3 * H])
        o = jax.nn.sigmoid(gates[:, 3 * H:4 * H])
        c = f * c + i * g
        h = o * jnp.tanh(c)
    z1 = jnp.tanh(h @ params["w1"].T + params["b1"])
    logits = z1 @ params["w2"].T + params["b2"]
    return jax.nn.log_softmax(logits, axis=-1)


def make_params(key, vocab_size, embedding_dim, hidden_lstm, hidden_mlp, tagset_size):
    ks = jax.random.split(key, 9)
    scale = 0.1
    return {
        "embedding": scale * jax.random.normal(ks[0], (vocab_size, embedding_dim), jnp.float32),
        "w_ih": scale * jax.random.normal(ks[1], (4 * hidden_lstm, embedding_dim), jnp.float32),
        "w_hh": scale * jax.random.normal(ks[2], (4 * hidden_lstm, hidden_lstm), jnp.float32),
        "b_ih": scale * jax.random.normal(ks[3], (4 * hidden_lstm,), jnp.float32),
        "b_hh": scale * jax.random.normal(ks[4], (4 * hidden_lstm,), jnp.float32),
        "w1": scale * jax.random.normal(ks[5], (hidden_mlp, hidden_lstm), jnp.float32),
        "b1": scale * jax.random.normal(ks[6], (hidden_mlp,), jnp.float32),
        "w2": scale * jax.random.normal(ks[7], (tagset_size, hidden_mlp), jnp.float32),
        "b2": scale * jax.random.normal(ks[8], (tagset_size,), jnp.float32),
    }


if __name__ == "__main__":
    vocab_size = 50
    embedding_dim = 32
    hidden_lstm = 32
    hidden_mlp = 32
    tagset_size = 2
    seq_len = 8

    key = jax.random.PRNGKey(0)
    pkey, skey = jax.random.split(key)
    params = make_params(pkey, vocab_size, embedding_dim, hidden_lstm,
                         hidden_mlp, tagset_size)
    sentence = jax.random.randint(skey, (1, seq_len), 0, vocab_size, jnp.int32)

    out = acceptor_forward(sentence, params)
    out = jax.block_until_ready(out)

    ref = _reference_forward(sentence, params)
    assert out.shape == (1, tagset_size)
    assert jnp.allclose(out, ref, atol=1e-4, rtol=1e-4)

    print("KERNEL_OK")
</pallas_src>

<mosaic_0001>
module attributes {stable_mosaic.version = 11 : i64} {
  func.func @_acceptor_kernel(%arg0: memref<8xi32, #tpu.memory_space<smem>>, %arg1: memref<50x128xf32, #tpu.memory_space<vmem>>, %arg2: memref<32x128xf32, #tpu.memory_space<vmem>>, %arg3: memref<32x32xf32, #tpu.memory_space<vmem>>, %arg4: memref<1x32xf32, #tpu.memory_space<vmem>>, %arg5: memref<32x2xf32, #tpu.memory_space<vmem>>, %arg6: memref<1x2xf32, #tpu.memory_space<vmem>>, %arg7: memref<1x2xf32, #tpu.memory_space<vmem>>) attributes {dimension_semantics = [], scalar_prefetch = 0 : i64, scratch_operands = 0 : i64, tpu.core_type = #tpu.core_type<tc>} {
    %c0 = arith.constant 0 : index
    %0 = memref.load %arg0[%c0] : memref<8xi32, #tpu.memory_space<smem>>
    %1 = arith.index_cast %0 : i32 to index
    %c0_0 = arith.constant 0 : index
    %2 = vector.load %arg1[%1, %c0_0] : memref<50x128xf32, #tpu.memory_space<vmem>>, vector<1x128xf32>
    %c1 = arith.constant 1 : index
    %3 = memref.load %arg0[%c1] : memref<8xi32, #tpu.memory_space<smem>>
    %4 = arith.index_cast %3 : i32 to index
    %c0_1 = arith.constant 0 : index
    %5 = vector.load %arg1[%4, %c0_1] : memref<50x128xf32, #tpu.memory_space<vmem>>, vector<1x128xf32>
    %c2 = arith.constant 2 : index
    %6 = memref.load %arg0[%c2] : memref<8xi32, #tpu.memory_space<smem>>
    %7 = arith.index_cast %6 : i32 to index
    %c0_2 = arith.constant 0 : index
    %8 = vector.load %arg1[%7, %c0_2] : memref<50x128xf32, #tpu.memory_space<vmem>>, vector<1x128xf32>
    %c3 = arith.constant 3 : index
    %9 = memref.load %arg0[%c3] : memref<8xi32, #tpu.memory_space<smem>>
    %10 = arith.index_cast %9 : i32 to index
    %c0_3 = arith.constant 0 : index
    %11 = vector.load %arg1[%10, %c0_3] : memref<50x128xf32, #tpu.memory_space<vmem>>, vector<1x128xf32>
    %c4 = arith.constant 4 : index
    %12 = memref.load %arg0[%c4] : memref<8xi32, #tpu.memory_space<smem>>
    %13 = arith.index_cast %12 : i32 to index
    %c0_4 = arith.constant 0 : index
    %14 = vector.load %arg1[%13, %c0_4] : memref<50x128xf32, #tpu.memory_space<vmem>>, vector<1x128xf32>
    %c5 = arith.constant 5 : index
    %15 = memref.load %arg0[%c5] : memref<8xi32, #tpu.memory_space<smem>>
    %16 = arith.index_cast %15 : i32 to index
    %c0_5 = arith.constant 0 : index
    %17 = vector.load %arg1[%16, %c0_5] : memref<50x128xf32, #tpu.memory_space<vmem>>, vector<1x128xf32>
    %c6 = arith.constant 6 : index
    %18 = memref.load %arg0[%c6] : memref<8xi32, #tpu.memory_space<smem>>
    %19 = arith.index_cast %18 : i32 to index
    %c0_6 = arith.constant 0 : index
    %20 = vector.load %arg1[%19, %c0_6] : memref<50x128xf32, #tpu.memory_space<vmem>>, vector<1x128xf32>
    %c7 = arith.constant 7 : index
    %21 = memref.load %arg0[%c7] : memref<8xi32, #tpu.memory_space<smem>>
    %22 = arith.index_cast %21 : i32 to index
    %c0_7 = arith.constant 0 : index
    %23 = vector.load %arg1[%22, %c0_7] : memref<50x128xf32, #tpu.memory_space<vmem>>, vector<1x128xf32>
    %c0_8 = arith.constant 0 : index
    %c0_9 = arith.constant 0 : index
    %24 = vector.load %arg2[%c0_8, %c0_9] : memref<32x128xf32, #tpu.memory_space<vmem>>, vector<32x128xf32>
    %cst = arith.constant 0.000000e+00 : f32
    %25 = vector.broadcast %cst : f32 to vector<1x32xf32>
    %cst_10 = arith.constant 0.000000e+00 : f32
    %26 = vector.broadcast %cst_10 : f32 to vector<1x32xf32>
    %cst_11 = arith.constant dense<0.000000e+00> : vector<1x128xf32>
    %27 = tpu.matmul %25, %24, %cst_11 {dimension_numbers = #tpu.dot_dimension_numbers<[1], [0], [0], [1], [0, 0, 1, 1], [], []>} : vector<1x32xf32>, vector<32x128xf32>, vector<1x128xf32> -> vector<1x128xf32>
    %28 = arith.addf %2, %27 : vector<1x128xf32>
    %29 = arith.negf %28 : vector<1x128xf32>
    %30 = math.exp %29 : vector<1x128xf32>
    %cst_12 = arith.constant 1.000000e+00 : f32
    %31 = vector.broadcast %cst_12 : f32 to vector<1x128xf32>
    %32 = arith.addf %31, %30 : vector<1x128xf32>
    %33 = arith.divf %31, %32 : vector<1x128xf32>
    %34 = vector.extract_strided_slice %33 {offsets = [0, 0], sizes = [1, 32], strides = [1, 1]} : vector<1x128xf32> to vector<1x32xf32>
    %35 = vector.extract_strided_slice %33 {offsets = [0, 32], sizes = [1, 32], strides = [1, 1]} : vector<1x128xf32> to vector<1x32xf32>
    %36 = vector.extract_strided_slice %33 {offsets = [0, 64], sizes = [1, 32], strides = [1, 1]} : vector<1x128xf32> to vector<1x32xf32>
    %cst_13 = arith.constant 2.000000e+00 : f32
    %37 = vector.broadcast %cst_13 : f32 to vector<1x32xf32>
    %38 = arith.mulf %37, %36 : vector<1x32xf32>
    %cst_14 = arith.constant 1.000000e+00 : f32
    %39 = vector.broadcast %cst_14 : f32 to vector<1x32xf32>
    %40 = arith.subf %38, %39 : vector<1x32xf32>
    %41 = vector.extract_strided_slice %33 {offsets = [0, 96], sizes = [1, 32], strides = [1, 1]} : vector<1x128xf32> to vector<1x32xf32>
    %42 = arith.mulf %35, %26 : vector<1x32xf32>
    %43 = arith.mulf %34, %40 : vector<1x32xf32>
    %44 = arith.addf %42, %43 : vector<1x32xf32>
    %45 = math.tanh %44 : vector<1x32xf32>
    %46 = arith.mulf %41, %45 : vector<1x32xf32>
    %cst_15 = arith.constant dense<0.000000e+00> : vector<1x128xf32>
    %47 = tpu.matmul %46, %24, %cst_15 {dimension_numbers = #tpu.dot_dimension_numbers<[1], [0], [0], [1], [0, 0, 1, 1], [], []>} : vector<1x32xf32>, vector<32x128xf32>, vector<1x128xf32> -> vector<1x128xf32>
    %48 = arith.addf %5, %47 : vector<1x128xf32>
    %49 = arith.negf %48 : vector<1x128xf32>
    %50 = math.exp %49 : vector<1x128xf32>
    %cst_16 = arith.constant 1.000000e+00 : f32
    %51 = vector.broadcast %cst_16 : f32 to vector<1x128xf32>
    %52 = arith.addf %51, %50 : vector<1x128xf32>
    %53 = arith.divf %51, %52 : vector<1x128xf32>
    %54 = vector.extract_strided_slice %53 {offsets = [0, 0], sizes = [1, 32], strides = [1, 1]} : vector<1x128xf32> to vector<1x32xf32>
    %55 = vector.extract_strided_slice %53 {offsets = [0, 32], sizes = [1, 32], strides = [1, 1]} : vector<1x128xf32> to vector<1x32xf32>
    %56 = vector.extract_strided_slice %53 {offsets = [0, 64], sizes = [1, 32], strides = [1, 1]} : vector<1x128xf32> to vector<1x32xf32>
    %cst_17 = arith.constant 2.000000e+00 : f32
    %57 = vector.broadcast %cst_17 : f32 to vector<1x32xf32>
    %58 = arith.mulf %57, %56 : vector<1x32xf32>
    %cst_18 = arith.constant 1.000000e+00 : f32
    %59 = vector.broadcast %cst_18 : f32 to vector<1x32xf32>
    %60 = arith.subf %58, %59 : vector<1x32xf32>
    %61 = vector.extract_strided_slice %53 {offsets = [0, 96], sizes = [1, 32], strides = [1, 1]} : vector<1x128xf32> to vector<1x32xf32>
    %62 = arith.mulf %55, %44 : vector<1x32xf32>
    %63 = arith.mulf %54, %60 : vector<1x32xf32>
    %64 = arith.addf %62, %63 : vector<1x32xf32>
    %65 = math.tanh %64 : vector<1x32xf32>
    %66 = arith.mulf %61, %65 : vector<1x32xf32>
    %cst_19 = arith.constant dense<0.000000e+00> : vector<1x128xf32>
    %67 = tpu.matmul %66, %24, %cst_19 {dimension_numbers = #tpu.dot_dimension_numbers<[1], [0], [0], [1], [0, 0, 1, 1], [], []>} : vector<1x32xf32>, vector<32x128xf32>, vector<1x128xf32> -> vector<1x128xf32>
    %68 = arith.addf %8, %67 : vector<1x128xf32>
    %69 = arith.negf %68 : vector<1x128xf32>
    %70 = math.exp %69 : vector<1x128xf32>
    %cst_20 = arith.constant 1.000000e+00 : f32
    %71 = vector.broadcast %cst_20 : f32 to vector<1x128xf32>
    %72 = arith.addf %71, %70 : vector<1x128xf32>
    %73 = arith.divf %71, %72 : vector<1x128xf32>
    %74 = vector.extract_strided_slice %73 {offsets = [0, 0], sizes = [1, 32], strides = [1, 1]} : vector<1x128xf32> to vector<1x32xf32>
    %75 = vector.extract_strided_slice %73 {offsets = [0, 32], sizes = [1, 32], strides = [1, 1]} : vector<1x128xf32> to vector<1x32xf32>
    %76 = vector.extract_strided_slice %73 {offsets = [0, 64], sizes = [1, 32], strides = [1, 1]} : vector<1x128xf32> to vector<1x32xf32>
    %cst_21 = arith.constant 2.000000e+00 : f32
    %77 = vector.broadcast %cst_21 : f32 to vector<1x32xf32>
    %78 = arith.mulf %77, %76 : vector<1x32xf32>
    %cst_22 = arith.constant 1.000000e+00 : f32
    %79 = vector.broadcast %cst_22 : f32 to vector<1x32xf32>
    %80 = arith.subf %78, %79 : vector<1x32xf32>
    %81 = vector.extract_strided_slice %73 {offsets = [0, 96], sizes = [1, 32], strides = [1, 1]} : vector<1x128xf32> to vector<1x32xf32>
    %82 = arith.mulf %75, %64 : vector<1x32xf32>
    %83 = arith.mulf %74, %80 : vector<1x32xf32>
    %84 = arith.addf %82, %83 : vector<1x32xf32>
    %85 = math.tanh %84 : vector<1x32xf32>
    %86 = arith.mulf %81, %85 : vector<1x32xf32>
    %cst_23 = arith.constant dense<0.000000e+00> : vector<1x128xf32>
    %87 = tpu.matmul %86, %24, %cst_23 {dimension_numbers = #tpu.dot_dimension_numbers<[1], [0], [0], [1], [0, 0, 1, 1], [], []>} : vector<1x32xf32>, vector<32x128xf32>, vector<1x128xf32> -> vector<1x128xf32>
    %88 = arith.addf %11, %87 : vector<1x128xf32>
    %89 = arith.negf %88 : vector<1x128xf32>
    %90 = math.exp %89 : vector<1x128xf32>
    %cst_24 = arith.constant 1.000000e+00 : f32
    %91 = vector.broadcast %cst_24 : f32 to vector<1x128xf32>
    %92 = arith.addf %91, %90 : vector<1x128xf32>
    %93 = arith.divf %91, %92 : vector<1x128xf32>
    %94 = vector.extract_strided_slice %93 {offsets = [0, 0], sizes = [1, 32], strides = [1, 1]} : vector<1x128xf32> to vector<1x32xf32>
    %95 = vector.extract_strided_slice %93 {offsets = [0, 32], sizes = [1, 32], strides = [1, 1]} : vector<1x128xf32> to vector<1x32xf32>
    %96 = vector.extract_strided_slice %93 {offsets = [0, 64], sizes = [1, 32], strides = [1, 1]} : vector<1x128xf32> to vector<1x32xf32>
    %cst_25 = arith.constant 2.000000e+00 : f32
    %97 = vector.broadcast %cst_25 : f32 to vector<1x32xf32>
    %98 = arith.mulf %97, %96 : vector<1x32xf32>
    %cst_26 = arith.constant 1.000000e+00 : f32
    %99 = vector.broadcast %cst_26 : f32 to vector<1x32xf32>
    %100 = arith.subf %98, %99 : vector<1x32xf32>
    %101 = vector.extract_strided_slice %93 {offsets = [0, 96], sizes = [1, 32], strides = [1, 1]} : vector<1x128xf32> to vector<1x32xf32>
    %102 = arith.mulf %95, %84 : vector<1x32xf32>
    %103 = arith.mulf %94, %100 : vector<1x32xf32>
    %104 = arith.addf %102, %103 : vector<1x32xf32>
    %105 = math.tanh %104 : vector<1x32xf32>
    %106 = arith.mulf %101, %105 : vector<1x32xf32>
    %cst_27 = arith.constant dense<0.000000e+00> : vector<1x128xf32>
    %107 = tpu.matmul %106, %24, %cst_27 {dimension_numbers = #tpu.dot_dimension_numbers<[1], [0], [0], [1], [0, 0, 1, 1], [], []>} : vector<1x32xf32>, vector<32x128xf32>, vector<1x128xf32> -> vector<1x128xf32>
    %108 = arith.addf %14, %107 : vector<1x128xf32>
    %109 = arith.negf %108 : vector<1x128xf32>
    %110 = math.exp %109 : vector<1x128xf32>
    %cst_28 = arith.constant 1.000000e+00 : f32
    %111 = vector.broadcast %cst_28 : f32 to vector<1x128xf32>
    %112 = arith.addf %111, %110 : vector<1x128xf32>
    %113 = arith.divf %111, %112 : vector<1x128xf32>
    %114 = vector.extract_strided_slice %113 {offsets = [0, 0], sizes = [1, 32], strides = [1, 1]} : vector<1x128xf32> to vector<1x32xf32>
    %115 = vector.extract_strided_slice %113 {offsets = [0, 32], sizes = [1, 32], strides = [1, 1]} : vector<1x128xf32> to vector<1x32xf32>
    %116 = vector.extract_strided_slice %113 {offsets = [0, 64], sizes = [1, 32], strides = [1, 1]} : vector<1x128xf32> to vector<1x32xf32>
    %cst_29 = arith.constant 2.000000e+00 : f32
    %117 = vector.broadcast %cst_29 : f32 to vector<1x32xf32>
    %118 = arith.mulf %117, %116 : vector<1x32xf32>
    %cst_30 = arith.constant 1.000000e+00 : f32
    %119 = vector.broadcast %cst_30 : f32 to vector<1x32xf32>
    %120 = arith.subf %118, %119 : vector<1x32xf32>
    %121 = vector.extract_strided_slice %113 {offsets = [0, 96], sizes = [1, 32], strides = [1, 1]} : vector<1x128xf32> to vector<1x32xf32>
    %122 = arith.mulf %115, %104 : vector<1x32xf32>
    %123 = arith.mulf %114, %120 : vector<1x32xf32>
    %124 = arith.addf %122, %123 : vector<1x32xf32>
    %125 = math.tanh %124 : vector<1x32xf32>
    %126 = arith.mulf %121, %125 : vector<1x32xf32>
    %cst_31 = arith.constant dense<0.000000e+00> : vector<1x128xf32>
    %127 = tpu.matmul %126, %24, %cst_31 {dimension_numbers = #tpu.dot_dimension_numbers<[1], [0], [0], [1], [0, 0, 1, 1], [], []>} : vector<1x32xf32>, vector<32x128xf32>, vector<1x128xf32> -> vector<1x128xf32>
    %128 = arith.addf %17, %127 : vector<1x128xf32>
    %129 = arith.negf %128 : vector<1x128xf32>
    %130 = math.exp %129 : vector<1x128xf32>
    %cst_32 = arith.constant 1.000000e+00 : f32
    %131 = vector.broadcast %cst_32 : f32 to vector<1x128xf32>
    %132 = arith.addf %131, %130 : vector<1x128xf32>
    %133 = arith.divf %131, %132 : vector<1x128xf32>
    %134 = vector.extract_strided_slice %133 {offsets = [0, 0], sizes = [1, 32], strides = [1, 1]} : vector<1x128xf32> to vector<1x32xf32>
    %135 = vector.extract_strided_slice %133 {offsets = [0, 32], sizes = [1, 32], strides = [1, 1]} : vector<1x128xf32> to vector<1x32xf32>
    %136 = vector.extract_strided_slice %133 {offsets = [0, 64], sizes = [1, 32], strides = [1, 1]} : vector<1x128xf32> to vector<1x32xf32>
    %cst_33 = arith.constant 2.000000e+00 : f32
    %137 = vector.broadcast %cst_33 : f32 to vector<1x32xf32>
    %138 = arith.mulf %137, %136 : vector<1x32xf32>
    %cst_34 = arith.constant 1.000000e+00 : f32
    %139 = vector.broadcast %cst_34 : f32 to vector<1x32xf32>
    %140 = arith.subf %138, %139 : vector<1x32xf32>
    %141 = vector.extract_strided_slice %133 {offsets = [0, 96], sizes = [1, 32], strides = [1, 1]} : vector<1x128xf32> to vector<1x32xf32>
    %142 = arith.mulf %135, %124 : vector<1x32xf32>
    %143 = arith.mulf %134, %140 : vector<1x32xf32>
    %144 = arith.addf %142, %143 : vector<1x32xf32>
    %145 = math.tanh %144 : vector<1x32xf32>
    %146 = arith.mulf %141, %145 : vector<1x32xf32>
    %cst_35 = arith.constant dense<0.000000e+00> : vector<1x128xf32>
    %147 = tpu.matmul %146, %24, %cst_35 {dimension_numbers = #tpu.dot_dimension_numbers<[1], [0], [0], [1], [0, 0, 1, 1], [], []>} : vector<1x32xf32>, vector<32x128xf32>, vector<1x128xf32> -> vector<1x128xf32>
    %148 = arith.addf %20, %147 : vector<1x128xf32>
    %149 = arith.negf %148 : vector<1x128xf32>
    %150 = math.exp %149 : vector<1x128xf32>
    %cst_36 = arith.constant 1.000000e+00 : f32
    %151 = vector.broadcast %cst_36 : f32 to vector<1x128xf32>
    %152 = arith.addf %151, %150 : vector<1x128xf32>
    %153 = arith.divf %151, %152 : vector<1x128xf32>
    %154 = vector.extract_strided_slice %153 {offsets = [0, 0], sizes = [1, 32], strides = [1, 1]} : vector<1x128xf32> to vector<1x32xf32>
    %155 = vector.extract_strided_slice %153 {offsets = [0, 32], sizes = [1, 32], strides = [1, 1]} : vector<1x128xf32> to vector<1x32xf32>
    %156 = vector.extract_strided_slice %153 {offsets = [0, 64], sizes = [1, 32], strides = [1, 1]} : vector<1x128xf32> to vector<1x32xf32>
    %cst_37 = arith.constant 2.000000e+00 : f32
    %157 = vector.broadcast %cst_37 : f32 to vector<1x32xf32>
    %158 = arith.mulf %157, %156 : vector<1x32xf32>
    %cst_38 = arith.constant 1.000000e+00 : f32
    %159 = vector.broadcast %cst_38 : f32 to vector<1x32xf32>
    %160 = arith.subf %158, %159 : vector<1x32xf32>
    %161 = vector.extract_strided_slice %153 {offsets = [0, 96], sizes = [1, 32], strides = [1, 1]} : vector<1x128xf32> to vector<1x32xf32>
    %162 = arith.mulf %155, %144 : vector<1x32xf32>
    %163 = arith.mulf %154, %160 : vector<1x32xf32>
    %164 = arith.addf %162, %163 : vector<1x32xf32>
    %165 = math.tanh %164 : vector<1x32xf32>
    %166 = arith.mulf %161, %165 : vector<1x32xf32>
    %cst_39 = arith.constant dense<0.000000e+00> : vector<1x128xf32>
    %167 = tpu.matmul %166, %24, %cst_39 {dimension_numbers = #tpu.dot_dimension_numbers<[1], [0], [0], [1], [0, 0, 1, 1], [], []>} : vector<1x32xf32>, vector<32x128xf32>, vector<1x128xf32> -> vector<1x128xf32>
    %168 = arith.addf %23, %167 : vector<1x128xf32>
    %169 = arith.negf %168 : vector<1x128xf32>
    %170 = math.exp %169 : vector<1x128xf32>
    %cst_40 = arith.constant 1.000000e+00 : f32
    %171 = vector.broadcast %cst_40 : f32 to vector<1x128xf32>
    %172 = arith.addf %171, %170 : vector<1x128xf32>
    %173 = arith.divf %171, %172 : vector<1x128xf32>
    %174 = vector.extract_strided_slice %173 {offsets = [0, 0], sizes = [1, 32], strides = [1, 1]} : vector<1x128xf32> to vector<1x32xf32>
    %175 = vector.extract_strided_slice %173 {offsets = [0, 32], sizes = [1, 32], strides = [1, 1]} : vector<1x128xf32> to vector<1x32xf32>
    %176 = vector.extract_strided_slice %173 {offsets = [0, 64], sizes = [1, 32], strides = [1, 1]} : vector<1x128xf32> to vector<1x32xf32>
    %cst_41 = arith.constant 2.000000e+00 : f32
    %177 = vector.broadcast %cst_41 : f32 to vector<1x32xf32>
    %178 = arith.mulf %177, %176 : vector<1x32xf32>
    %cst_42 = arith.constant 1.000000e+00 : f32
    %179 = vector.broadcast %cst_42 : f32 to vector<1x32xf32>
    %180 = arith.subf %178, %179 : vector<1x32xf32>
    %181 = vector.extract_strided_slice %173 {offsets = [0, 96], sizes = [1, 32], strides = [1, 1]} : vector<1x128xf32> to vector<1x32xf32>
    %182 = arith.mulf %175, %164 : vector<1x32xf32>
    %183 = arith.mulf %174, %180 : vector<1x32xf32>
    %184 = arith.addf %182, %183 : vector<1x32xf32>
    %185 = math.tanh %184 : vector<1x32xf32>
    %186 = arith.mulf %181, %185 : vector<1x32xf32>
    %c0_43 = arith.constant 0 : index
    %c0_44 = arith.constant 0 : index
    %187 = vector.load %arg3[%c0_43, %c0_44] : memref<32x32xf32, #tpu.memory_space<vmem>>, vector<32x32xf32>
    %cst_45 = arith.constant dense<0.000000e+00> : vector<1x32xf32>
    %188 = tpu.matmul %186, %187, %cst_45 {dimension_numbers = #tpu.dot_dimension_numbers<[1], [0], [0], [1], [0, 0, 1, 1], [], []>} : vector<1x32xf32>, vector<32x32xf32>, vector<1x32xf32> -> vector<1x32xf32>
    %c0_46 = arith.constant 0 : index
    %c0_47 = arith.constant 0 : index
    %189 = vector.load %arg4[%c0_46, %c0_47] : memref<1x32xf32, #tpu.memory_space<vmem>>, vector<1x32xf32>
    %190 = arith.addf %188, %189 : vector<1x32xf32>
    %191 = math.tanh %190 : vector<1x32xf32>
    %c0_48 = arith.constant 0 : index
    %c0_49 = arith.constant 0 : index
    %192 = vector.load %arg5[%c0_48, %c0_49] : memref<32x2xf32, #tpu.memory_space<vmem>>, vector<32x2xf32>
    %cst_50 = arith.constant dense<0.000000e+00> : vector<1x2xf32>
    %193 = tpu.matmul %191, %192, %cst_50 {dimension_numbers = #tpu.dot_dimension_numbers<[1], [0], [0], [1], [0, 0, 1, 1], [], []>} : vector<1x32xf32>, vector<32x2xf32>, vector<1x2xf32> -> vector<1x2xf32>
    %c0_51 = arith.constant 0 : index
    %c0_52 = arith.constant 0 : index
    %194 = vector.load %arg6[%c0_51, %c0_52] : memref<1x2xf32, #tpu.memory_space<vmem>>, vector<1x2xf32>
    %195 = arith.addf %193, %194 : vector<1x2xf32>
    %cst_53 = arith.constant dense<0xFF800000> : vector<1xf32>
    %196 = vector.multi_reduction <maximumf>, %195, %cst_53 [1] : vector<1x2xf32> to vector<1xf32>
    %197 = vector.shape_cast %196 : vector<1xf32> to vector<1x1xf32>
    %198 = vector.broadcast %197 : vector<1x1xf32> to vector<1x2xf32>
    %199 = arith.subf %195, %198 : vector<1x2xf32>
    %200 = math.exp %199 : vector<1x2xf32>
    %cst_54 = arith.constant dense<0.000000e+00> : vector<1xf32>
    %201 = vector.multi_reduction <add>, %200, %cst_54 [1] : vector<1x2xf32> to vector<1xf32>
    %202 = vector.shape_cast %201 : vector<1xf32> to vector<1x1xf32>
    %203 = math.log %202 : vector<1x1xf32>
    %204 = vector.broadcast %203 : vector<1x1xf32> to vector<1x2xf32>
    %205 = arith.subf %199, %204 : vector<1x2xf32>
    %c0_55 = arith.constant 0 : index
    %c0_56 = arith.constant 0 : index
    %206 = vector.load %arg7[%c0_55, %c0_56] : memref<1x2xf32, #tpu.memory_space<vmem>>, vector<1x2xf32>
    tpu.vector_store %arg7[%c0_55, %c0_56], %205 {strides = array<i32>} : memref<1x2xf32, #tpu.memory_space<vmem>>, vector<1x2xf32>,
    return
  }
}

</mosaic_0001>

<bundles_post_ra>
// kernel: tpu_custom_call.1
= control target key start
LH: loop header
LB: loop body
LE: loop exit
PB: predicated region body
PF: predicated region fallthrough
CT: control target
= control target key end

     0   :  { %12 = vsyncpa [#allocation5], 0  ;;  %s1033_s0 = inlined_call_operand.vmem [shape: s32[8], index: 0, kind: input, shape index: {}]   ;;  %s1034_s1 = inlined_call_operand.hbm [shape: f32[50,128], index: 1, kind: input, shape index: {}]   ;;  %s1035_s2 = inlined_call_operand.vmem [shape: f32[32,128], index: 2, kind: input, shape index: {}]   ;;  %s1036_s3 = inlined_call_operand.hbm [shape: f32[32,32], index: 3, kind: input, shape index: {}]   ;;  %s1037_s4 = inlined_call_operand.vmem [shape: f32[1,32], index: 4, kind: input, shape index: {}]   ;;  %s1038_s5 = inlined_call_operand.vmem [shape: f32[32,2], index: 5, kind: input, shape index: {}]   ;;  %s1039_s6 = inlined_call_operand.vmem [shape: f32[1,2], index: 6, kind: input, shape index: {}]   ;;  %s1040_s7 = inlined_call_operand.hbm [shape: f32[1,2], index: 7, kind: output, shape index: {}]  }
   0x1   :  { %13 = vsyncpa [#allocation3], 0 }
   0x2   :  { %14 = vsyncpa [#allocation8], 0 }
   0x3   :  { %15 = vsyncpa [#allocation4], 0  ;;  %s21_s26 = sshll.u32 %s1033_s0, 4  ;;  %s29_s29 = sshll.u32 %s1034_s1, 4  ;;  %s22_s26 = int_to_ptr.vmem [resolvable:$true] %s21_s26  ;;  %s30_s29 = int_to_ptr.hbm [resolvable:$true] %s29_s29 }
   0x4   :  { %s898_s30 = smov [#allocation2]   ;;  %s899_s8 = smov [#allocation6]  }
   0x5   :  { %24 = dma.vmem_to_smem %s22_s26, 16, %s898_s30, [#allocation5]  }
   0x6   :  { %s31_s9 = sshll.u32 %s899_s8, 4  ;;  %s900_s10 = smov 128   ;;  %s32_s9 = int_to_ptr.vmem [resolvable:$true] %s31_s9 }
   0x7   :  { %s901_s11 = smov 8   ;;  %s44_s14 = sshll.u32 %s1036_s3, 4  ;;  %s45_s14 = int_to_ptr.hbm [resolvable:$true] %s44_s14 }
   0x8   :  { %37 = dma.hbm_to_vmem [thread:$0]  %s30_s29, 896, %s32_s9, [#allocation3], %s900_s10, %s900_s10, %s901_s11  }
   0x9   :  { %s902_s0 = smov [#allocation7]  }
   0xa   :  { %s46_s15 = sshll.u32 %s902_s0, 4  ;;  %s47_s15 = int_to_ptr.vmem [resolvable:$true] %s46_s15 }
   0xb   :  { %52 = dma.hbm_to_vmem [thread:$0]  %s45_s14, 512, %s47_s15, [#allocation8], %s900_s10, %s900_s10, %s901_s11  }
   0xc   :  { %890 = dma.done.wait [#allocation5], 16  }
   0xd   :  { %891 = vsyncadd [#allocation5], 4294967280 }
   0xe   :  { %892 = dma.done.wait [#allocation3], 896  }
   0xf   :  { %893 = vsyncadd [#allocation3], 4294966400 }
  0x10   :  { %894 = dma.done.wait [#allocation8], 512  }
  0x11   :  { %895 = vsyncadd [#allocation8], 4294966784 }
  0x12   :  { %71 = sfence }
  0x13   :  { %v99_v0 = vld [vmem:[%s1035_s2 + $0x18] sm:$0xff]  ;;  %v98_v1 = vld [vmem:[%s1035_s2 + $0x10] sm:$0xff]  ;;  %v97_v2 = vld [vmem:[%s1035_s2 + $0x8] sm:$0xff]  ;;  %v903_v4 = vmov 0.0   ;;  %s904_s23 = smov 64   ;;  %s905_s24 = smov 32  }
  0x14   :  { %116 = vmatpush.msra.mxu0 %v99_v0  ;;  %180 = vmatpush.msra.mxu1 %v99_v0  ;;  %v96_v3 = vld [vmem:[%s1035_s2] sm:$0xff]  ;;  %s72_s2 = sld [smem:[#allocation2]]  ;;  %vm100_vm4 = vcmask 261120  }
  0x15   :  { %244 = vmatpush.msra.mxu2 %v99_v0  ;;  %308 = vmatpush.msra.mxu3 %v99_v0  ;;  %s711_s25 = sld [smem:[#allocation2 + $0x1]] }
  0x16   :  { %117 = vmatpush.msra.mxu0 %v98_v1  ;;  %181 = vmatpush.msra.mxu1 %v98_v1  ;;  %s712_s27 = sld [smem:[#allocation2 + $0x2]] }
  0x17   :  { %245 = vmatpush.msra.mxu2 %v98_v1  ;;  %309 = vmatpush.msra.mxu3 %v98_v1  ;;  %s713_s29 = sld [smem:[#allocation2 + $0x3]] }
  0x18   :  { %118 = vmatpush.msra.mxu0 %v97_v2  ;;  %182 = vmatpush.msra.mxu1 %v97_v2  ;;  %s714_s8 = sld [smem:[#allocation2 + $0x4]] }
  0x19   :  { %246 = vmatpush.msra.mxu2 %v97_v2  ;;  %310 = vmatpush.msra.mxu3 %v97_v2  ;;  %s715_s10 = sld [smem:[#allocation2 + $0x5]] }
  0x1a   :  { %119 = vmatpush.msra.mxu0 %v96_v3  ;;  %183 = vmatpush.msra.mxu1 %v96_v3  ;;  %s73_s22 = scalar_lea.vmem [#allocation6], %s72_s2  ;;  %s716_s12 = sld [smem:[#allocation2 + $0x6]] }
  0x1b   :  { %120 = vmatmul.f32.vlgmr.msra.gmra.mxu0 %v903_v4  ;;  %247 = vmatpush.msra.mxu2 %v96_v3  ;;  %v74_v5 = vld [vmem:[%s73_s22] sm:$0x1]  ;;  %s76_s26 = scalar_lea.vmem [#allocation6], %s711_s25  ;;  %s717_s14 = sld [smem:[#allocation2 + $0x7]] }
  0x1c   :  { %311 = vmatpush.msra.mxu3 %v96_v3  ;;  %372 = vmatpush.msrb.mxu0 %v99_v0  ;;  %v77_v32 = vld [vmem:[%s76_s26] sm:$0x1]  ;;  %s79_s28 = scalar_lea.vmem [#allocation6], %s712_s27  ;;  %s691_s25 = sshll.u32 %s1040_s7, 4  ;;  %s692_s25 = int_to_ptr.hbm [resolvable:$true] %s691_s25 }
  0x1d   :  { %436 = vmatpush.msrb.mxu1 %v99_v0  ;;  %500 = vmatpush.msrb.mxu2 %v99_v0  ;;  %v80_v59 = vld [vmem:[%s79_s28] sm:$0x1]  ;;  %s82_s30 = scalar_lea.vmem [#allocation6], %s713_s29 }
  0x1e   :  { %373 = vmatpush.msrb.mxu0 %v98_v1  ;;  %564 = vmatpush.msrb.mxu3 %v99_v0  ;;  %s85_s9 = scalar_lea.vmem [#allocation6], %s714_s8 }
  0x1f   :  { %437 = vmatpush.msrb.mxu1 %v98_v1  ;;  %501 = vmatpush.msrb.mxu2 %v98_v1  ;;  %s88_s11 = scalar_lea.vmem [#allocation6], %s715_s10 }
  0x20   :  { %374 = vmatpush.msrb.mxu0 %v97_v2  ;;  %565 = vmatpush.msrb.mxu3 %v98_v1  ;;  %s91_s13 = scalar_lea.vmem [#allocation6], %s716_s12 }
  0x21   :  { %438 = vmatpush.msrb.mxu1 %v97_v2  ;;  %502 = vmatpush.msrb.mxu2 %v97_v2  ;;  %s94_s0 = scalar_lea.vmem [#allocation6], %s717_s14 }
  0x22   :  { %375 = vmatpush.msrb.mxu0 %v96_v3  ;;  %566 = vmatpush.msrb.mxu3 %v97_v2 }
  0x23   :  { %439 = vmatpush.msrb.mxu1 %v96_v3  ;;  %503 = vmatpush.msrb.mxu2 %v96_v3 }
  0x24   :  { %567 = vmatpush.msrb.mxu3 %v96_v3 }
  0x98   :  { %v121_v6 = vpop.f32.mrf.mxu0 }
  0x99   :  { %v124_v7 = vadd.f32 %v121_v6, %v74_v5 }
  0x9b   :  { %v718_v8 = vmul.f32 -1.442695, %v124_v7 }
  0x9d   :  { %752 = vpow2.f32 %v718_v8 }
  0xa3   :  { %v753_v9 = vpop.eup %752 }
  0xa4   :  { %v128_v10 = vadd.f32 1.0, %v753_v9 }
  0xa6   :  { %754 = vrcp.f32 %v128_v10  ;;  %v140_v14 = vand.u32 2147483648, %v128_v10  ;;  %v138_v16 = vand.u32 2147483647, %v128_v10  ;;  %vm134_vm1 = vweird.f32 %v128_v10 }
  0xa8   :  { %v141_v18 = vor.u32 1.1754944e-38, %v140_v14  ;;  %vm139_vm3 = vcmp.eq.f32.partialorder %v138_v16, 8.507059e+37 }
  0xac   :  { %v755_v11 = vpop.eup %754 }
  0xad   :  { %v130_v12 = vmul.f32 %v755_v11, %v128_v10  ;;  %vm135_vm0 = vweird.f32 %v755_v11 }
  0xae   :  { %vm136_vm2 = vmor %vm134_vm1, %vm135_vm0 }
  0xaf   :  { %v131_v13 = vsub.f32 1.0, %v130_v12 }
  0xb1   :  { %v132_v15 = vmul.f32 %v755_v11, %v131_v13 }
  0xb3   :  { %v133_v17 = vadd.f32 %v755_v11, %v132_v15 }
  0xb5   :  { %v137_v19 = vsel %vm136_vm2, %v755_v11, %v133_v17 }
  0xb6   :  { %v142_v20 = vsel %vm139_vm3, %v141_v18, %v137_v19 }
  0xb7   :  { %v144_v21 = vmul.f32 2.0, %v142_v20  ;;  %v146_v25 = vmul.f32 0.0, %v142_v20 }
  0xb9   :  { %v719_v22 = vadd.f32 -1.0, %v144_v21 }
  0xbb   :  { %148 = vrot.lane.b32.xlu0 %v719_v22, %s904_s23  ;;  %v83_v22 = vld [vmem:[%s82_s30] sm:$0x1] }
 0x12d   :  { %v149_v23 = vpop.permute.xlu0 %148 }
 0x12e   :  { %v151_v24 = vmul.f32 %v149_v23, %v142_v20 }
 0x130   :  { %153 = vrot.lane.b32.xlu0 %v151_v24, %s905_s24 }
 0x1a2   :  { %v154_v26 = vpop.permute.xlu0 %153 }
 0x1a3   :  { %v156_v27 = vadd.f32 %v154_v26, %v146_v25 }
 0x1a5   :  { %756 = vtanh.f32 %v156_v27 }
 0x1ab   :  { %v757_v28 = vpop.eup %756 }
 0x1ac   :  { %159 = vrot.lane.b32.xlu1 %v757_v28, %s904_s23 }
 0x21e   :  { %v160_v29 = vpop.permute.xlu1 %159 }
 0x21f   :  { %v162_v30 = vmul.f32 %v160_v29, %v142_v20 }
 0x221   :  { %164 = vrot.lane.b32.xlu1 %v162_v30, %s905_s24 }
 0x293   :  { %v165_v31 = vpop.permute.xlu1 %164 }
 0x294   :  { %720 = vmatmul.msk.f32.vlgmr.msra.gmra.mxu1 %vm100_vm4, %v165_v31 }
 0x311   :  { %v185_v33 = vpop.f32.mrf.mxu1 }
 0x312   :  { %v188_v34 = vadd.f32 %v185_v33, %v77_v32 }
 0x314   :  { %v721_v35 = vmul.f32 -1.442695, %v188_v34 }
 0x316   :  { %758 = vpow2.f32 %v721_v35 }
 0x31c   :  { %v759_v36 = vpop.eup %758 }
 0x31d   :  { %v192_v37 = vadd.f32 1.0, %v759_v36 }
 0x31f   :  { %760 = vrcp.f32 %v192_v37  ;;  %v204_v41 = vand.u32 2147483648, %v192_v37  ;;  %v202_v43 = vand.u32 2147483647, %v192_v37  ;;  %vm198_vm6 = vweird.f32 %v192_v37 }
 0x321   :  { %v205_v45 = vor.u32 1.1754944e-38, %v204_v41  ;;  %vm203_vm8 = vcmp.eq.f32.partialorder %v202_v43, 8.507059e+37 }
 0x325   :  { %v761_v38 = vpop.eup %760 }
 0x326   :  { %v194_v39 = vmul.f32 %v761_v38, %v192_v37  ;;  %vm199_vm5 = vweird.f32 %v761_v38 }
 0x327   :  { %vm200_vm7 = vmor %vm198_vm6, %vm199_vm5 }
 0x328   :  { %v195_v40 = vsub.f32 1.0, %v194_v39 }
 0x32a   :  { %v196_v42 = vmul.f32 %v761_v38, %v195_v40 }
 0x32c   :  { %v197_v44 = vadd.f32 %v761_v38, %v196_v42 }
 0x32e   :  { %v201_v46 = vsel %vm200_vm7, %v761_v38, %v197_v44 }
 0x32f   :  { %v206_v47 = vsel %vm203_vm8, %v205_v45, %v201_v46 }
 0x330   :  { %v208_v48 = vmul.f32 2.0, %v206_v47  ;;  %v210_v52 = vmul.f32 %v206_v47, %v156_v27 }
 0x332   :  { %v722_v49 = vadd.f32 -1.0, %v208_v48 }
 0x334   :  { %212 = vrot.lane.b32.xlu2 %v722_v49, %s904_s23  ;;  %v86_v49 = vld [vmem:[%s85_s9] sm:$0x1] }
 0x38e   :  { %v213_v50 = vpop.permute.xlu2 %212 }
 0x38f   :  { %v215_v51 = vmul.f32 %v213_v50, %v206_v47 }
 0x391   :  { %217 = vrot.lane.b32.xlu2 %v215_v51, %s905_s24 }
 0x3eb   :  { %v218_v53 = vpop.permute.xlu2 %217 }
 0x3ec   :  { %v220_v54 = vadd.f32 %v218_v53, %v210_v52 }
 0x3ee   :  { %762 = vtanh.f32 %v220_v54 }
 0x3f4   :  { %v763_v55 = vpop.eup %762 }
 0x3f5   :  { %223 = vrot.lane.b32.xlu0 %v763_v55, %s904_s23 }
 0x467   :  { %v224_v56 = vpop.permute.xlu0 %223 }
 0x468   :  { %v226_v57 = vmul.f32 %v224_v56, %v206_v47 }
 0x46a   :  { %228 = vrot.lane.b32.xlu1 %v226_v57, %s905_s24 }
 0x4dc   :  { %v229_v58 = vpop.permute.xlu1 %228 }
 0x4dd   :  { %723 = vmatmul.msk.f32.vlgmr.msra.gmra.mxu2 %vm100_vm4, %v229_v58 }
 0x560   :  { %v249_v60 = vpop.f32.mrf.mxu2 }
 0x561   :  { %v252_v61 = vadd.f32 %v249_v60, %v80_v59 }
 0x563   :  { %v724_v62 = vmul.f32 -1.442695, %v252_v61 }
 0x565   :  { %764 = vpow2.f32 %v724_v62 }
 0x56b   :  { %v765_v63 = vpop.eup %764 }
 0x56c   :  { %v256_v0 = vadd.f32 1.0, %v765_v63 }
 0x56e   :  { %766 = vrcp.f32 %v256_v0  ;;  %v268_v4 = vand.u32 2147483648, %v256_v0  ;;  %v266_v6 = vand.u32 2147483647, %v256_v0  ;;  %vm262_vm10 = vweird.f32 %v256_v0 }
 0x570   :  { %v269_v8 = vor.u32 1.1754944e-38, %v268_v4  ;;  %vm267_vm12 = vcmp.eq.f32.partialorder %v266_v6, 8.507059e+37 }
 0x574   :  { %v767_v1 = vpop.eup %766 }
 0x575   :  { %v258_v2 = vmul.f32 %v767_v1, %v256_v0  ;;  %vm263_vm9 = vweird.f32 %v767_v1 }
 0x576   :  { %vm264_vm11 = vmor %vm262_vm10, %vm263_vm9 }
 0x577   :  { %v259_v3 = vsub.f32 1.0, %v258_v2 }
 0x579   :  { %v260_v5 = vmul.f32 %v767_v1, %v259_v3 }
 0x57b   :  { %v261_v7 = vadd.f32 %v767_v1, %v260_v5 }
 0x57d   :  { %v265_v9 = vsel %vm264_vm11, %v767_v1, %v261_v7 }
 0x57e   :  { %v270_v10 = vsel %vm267_vm12, %v269_v8, %v265_v9 }
 0x57f   :  { %v272_v11 = vmul.f32 2.0, %v270_v10  ;;  %v274_v15 = vmul.f32 %v270_v10, %v220_v54 }
 0x581   :  { %v725_v12 = vadd.f32 -1.0, %v272_v11 }
 0x583   :  { %276 = vrot.lane.b32.xlu2 %v725_v12, %s904_s23  ;;  %v89_v12 = vld [vmem:[%s88_s11] sm:$0x1] }
 0x5dd   :  { %v277_v13 = vpop.permute.xlu2 %276 }
 0x5de   :  { %v279_v14 = vmul.f32 %v277_v13, %v270_v10 }
 0x5e0   :  { %281 = vrot.lane.b32.xlu0 %v279_v14, %s905_s24 }
 0x652   :  { %v282_v16 = vpop.permute.xlu0 %281 }
 0x653   :  { %v284_v17 = vadd.f32 %v282_v16, %v274_v15 }
 0x655   :  { %768 = vtanh.f32 %v284_v17 }
 0x65b   :  { %v769_v18 = vpop.eup %768 }
 0x65c   :  { %287 = vrot.lane.b32.xlu1 %v769_v18, %s904_s23 }
 0x6ce   :  { %v288_v19 = vpop.permute.xlu1 %287 }
 0x6cf   :  { %v290_v20 = vmul.f32 %v288_v19, %v270_v10 }
 0x6d1   :  { %292 = vrot.lane.b32.xlu2 %v290_v20, %s905_s24 }
 0x72b   :  { %v293_v21 = vpop.permute.xlu2 %292 }
 0x72c   :  { %726 = vmatmul.msk.f32.vlgmr.msra.gmra.mxu3 %vm100_vm4, %v293_v21 }
 0x7af   :  { %v313_v23 = vpop.f32.mrf.mxu3 }
 0x7b0   :  { %v316_v24 = vadd.f32 %v313_v23, %v83_v22 }
 0x7b2   :  { %v727_v25 = vmul.f32 -1.442695, %v316_v24 }
 0x7b4   :  { %770 = vpow2.f32 %v727_v25 }
 0x7ba   :  { %v771_v26 = vpop.eup %770 }
 0x7bb   :  { %v320_v27 = vadd.f32 1.0, %v771_v26 }
 0x7bd   :  { %772 = vrcp.f32 %v320_v27  ;;  %v332_v31 = vand.u32 2147483648, %v320_v27  ;;  %v330_v33 = vand.u32 2147483647, %v320_v27  ;;  %vm326_vm14 = vweird.f32 %v320_v27 }
 0x7bf   :  { %v333_v35 = vor.u32 1.1754944e-38, %v332_v31  ;;  %vm331_vm0 = vcmp.eq.f32.partialorder %v330_v33, 8.507059e+37 }
 0x7c3   :  { %v773_v28 = vpop.eup %772 }
 0x7c4   :  { %v322_v29 = vmul.f32 %v773_v28, %v320_v27  ;;  %vm327_vm13 = vweird.f32 %v773_v28 }
 0x7c5   :  { %vm328_vm15 = vmor %vm326_vm14, %vm327_vm13 }
 0x7c6   :  { %v323_v30 = vsub.f32 1.0, %v322_v29 }
 0x7c8   :  { %v324_v32 = vmul.f32 %v773_v28, %v323_v30 }
 0x7ca   :  { %v325_v34 = vadd.f32 %v773_v28, %v324_v32 }
 0x7cc   :  { %v329_v36 = vsel %vm328_vm15, %v773_v28, %v325_v34 }
 0x7cd   :  { %v334_v37 = vsel %vm331_vm0, %v333_v35, %v329_v36 }
 0x7ce   :  { %v336_v38 = vmul.f32 2.0, %v334_v37  ;;  %v338_v42 = vmul.f32 %v334_v37, %v284_v17 }
 0x7d0   :  { %v728_v39 = vadd.f32 -1.0, %v336_v38 }
 0x7d2   :  { %340 = vrot.lane.b32.xlu0 %v728_v39, %s904_s23  ;;  %v92_v39 = vld [vmem:[%s91_s13] sm:$0x1] }
 0x844   :  { %v341_v40 = vpop.permute.xlu0 %340 }
 0x845   :  { %v343_v41 = vmul.f32 %v341_v40, %v334_v37 }
 0x847   :  { %345 = vrot.lane.b32.xlu1 %v343_v41, %s905_s24 }
 0x8b9   :  { %v346_v43 = vpop.permute.xlu1 %345 }
 0x8ba   :  { %v348_v44 = vadd.f32 %v346_v43, %v338_v42 }
 0x8bc   :  { %774 = vtanh.f32 %v348_v44 }
 0x8c2   :  { %v775_v45 = vpop.eup %774 }
 0x8c3   :  { %351 = vrot.lane.b32.xlu2 %v775_v45, %s904_s23 }
 0x91d   :  { %v352_v46 = vpop.permute.xlu2 %351 }
 0x91e   :  { %v354_v47 = vmul.f32 %v352_v46, %v334_v37 }
 0x920   :  { %356 = vrot.lane.b32.xlu0 %v354_v47, %s905_s24 }
 0x992   :  { %v357_v48 = vpop.permute.xlu0 %356 }
 0x993   :  { %729 = vmatmul.msk.f32.vlgmr.msrb.gmra.mxu0 %vm100_vm4, %v357_v48 }
 0xa10   :  { %v377_v50 = vpop.f32.mrf.mxu0 }
 0xa11   :  { %v380_v51 = vadd.f32 %v377_v50, %v86_v49 }
 0xa13   :  { %v730_v52 = vmul.f32 -1.442695, %v380_v51 }
 0xa15   :  { %776 = vpow2.f32 %v730_v52 }
 0xa1b   :  { %v777_v53 = vpop.eup %776 }
 0xa1c   :  { %v384_v54 = vadd.f32 1.0, %v777_v53 }
 0xa1e   :  { %778 = vrcp.f32 %v384_v54  ;;  %v396_v58 = vand.u32 2147483648, %v384_v54  ;;  %v394_v60 = vand.u32 2147483647, %v384_v54  ;;  %vm390_vm2 = vweird.f32 %v384_v54 }
 0xa20   :  { %v397_v62 = vor.u32 1.1754944e-38, %v396_v58  ;;  %vm395_vm5 = vcmp.eq.f32.partialorder %v394_v60, 8.507059e+37 }
 0xa24   :  { %v779_v55 = vpop.eup %778 }
 0xa25   :  { %v386_v56 = vmul.f32 %v779_v55, %v384_v54  ;;  %vm391_vm1 = vweird.f32 %v779_v55 }
 0xa26   :  { %vm392_vm3 = vmor %vm390_vm2, %vm391_vm1  ;;  %vm670_vm2 = vcmask 8192  }
 0xa27   :  { %v387_v57 = vsub.f32 1.0, %v386_v56 }
 0xa29   :  { %v388_v59 = vmul.f32 %v779_v55, %v387_v57 }
 0xa2b   :  { %v389_v61 = vadd.f32 %v779_v55, %v388_v59 }
 0xa2d   :  { %v393_v63 = vsel %vm392_vm3, %v779_v55, %v389_v61 }
 0xa2e   :  { %v398_v0 = vsel %vm395_vm5, %v397_v62, %v393_v63 }
 0xa2f   :  { %v400_v1 = vmul.f32 2.0, %v398_v0  ;;  %v402_v5 = vmul.f32 %v398_v0, %v348_v44 }
 0xa31   :  { %v731_v2 = vadd.f32 -1.0, %v400_v1 }
 0xa33   :  { %404 = vrot.lane.b32.xlu1 %v731_v2, %s904_s23  ;;  %v95_v2 = vld [vmem:[%s94_s0] sm:$0x1] }
 0xaa5   :  { %v405_v3 = vpop.permute.xlu1 %404 }
 0xaa6   :  { %v407_v4 = vmul.f32 %v405_v3, %v398_v0 }
 0xaa8   :  { %409 = vrot.lane.b32.xlu2 %v407_v4, %s905_s24 }
 0xb02   :  { %v410_v6 = vpop.permute.xlu2 %409 }
 0xb03   :  { %v412_v7 = vadd.f32 %v410_v6, %v402_v5 }
 0xb05   :  { %780 = vtanh.f32 %v412_v7 }
 0xb0b   :  { %v781_v8 = vpop.eup %780 }
 0xb0c   :  { %415 = vrot.lane.b32.xlu0 %v781_v8, %s904_s23 }
 0xb7e   :  { %v416_v9 = vpop.permute.xlu0 %415 }
 0xb7f   :  { %v418_v10 = vmul.f32 %v416_v9, %v398_v0 }
 0xb81   :  { %420 = vrot.lane.b32.xlu1 %v418_v10, %s905_s24 }
 0xbf3   :  { %v421_v11 = vpop.permute.xlu1 %420 }
 0xbf4   :  { %732 = vmatmul.msk.f32.vlgmr.msrb.gmra.mxu1 %vm100_vm4, %v421_v11 }
 0xc71   :  { %v441_v13 = vpop.f32.mrf.mxu1 }
 0xc72   :  { %v444_v14 = vadd.f32 %v441_v13, %v89_v12 }
 0xc74   :  { %v733_v15 = vmul.f32 -1.442695, %v444_v14 }
 0xc76   :  { %782 = vpow2.f32 %v733_v15 }
 0xc7c   :  { %v783_v16 = vpop.eup %782 }
 0xc7d   :  { %v448_v17 = vadd.f32 1.0, %v783_v16 }
 0xc7f   :  { %784 = vrcp.f32 %v448_v17  ;;  %v460_v21 = vand.u32 2147483648, %v448_v17  ;;  %v458_v23 = vand.u32 2147483647, %v448_v17  ;;  %vm454_vm7 = vweird.f32 %v448_v17 }
 0xc81   :  { %v461_v25 = vor.u32 1.1754944e-38, %v460_v21  ;;  %vm459_vm9 = vcmp.eq.f32.partialorder %v458_v23, 8.507059e+37 }
 0xc85   :  { %v785_v18 = vpop.eup %784 }
 0xc86   :  { %v450_v19 = vmul.f32 %v785_v18, %v448_v17  ;;  %vm455_vm6 = vweird.f32 %v785_v18 }
 0xc87   :  { %vm456_vm8 = vmor %vm454_vm7, %vm455_vm6 }
 0xc88   :  { %v451_v20 = vsub.f32 1.0, %v450_v19 }
 0xc8a   :  { %v452_v22 = vmul.f32 %v785_v18, %v451_v20 }
 0xc8c   :  { %v453_v24 = vadd.f32 %v785_v18, %v452_v22 }
 0xc8e   :  { %v457_v26 = vsel %vm456_vm8, %v785_v18, %v453_v24 }
 0xc8f   :  { %v462_v27 = vsel %vm459_vm9, %v461_v25, %v457_v26  ;;  %v614_v26 = vld [vmem:[#allocation7 + $0x18] sm:$0xff] }
 0xc90   :  { %v464_v28 = vmul.f32 2.0, %v462_v27  ;;  %v466_v32 = vmul.f32 %v462_v27, %v412_v7  ;;  %633 = vmatpush.msra.mxu0 %v614_v26 }
 0xc92   :  { %v734_v29 = vadd.f32 -1.0, %v464_v28  ;;  %v612_v28 = vld [vmem:[#allocation7 + $0x8] sm:$0xff] }
 0xc94   :  { %468 = vrot.lane.b32.xlu2 %v734_v29, %s904_s23  ;;  %v611_v29 = vld [vmem:[#allocation7] sm:$0xff] }
 0xcee   :  { %v469_v30 = vpop.permute.xlu2 %468 }
 0xcef   :  { %v471_v31 = vmul.f32 %v469_v30, %v462_v27 }
 0xcf1   :  { %473 = vrot.lane.b32.xlu0 %v471_v31, %s905_s24 }
 0xd63   :  { %v474_v33 = vpop.permute.xlu0 %473 }
 0xd64   :  { %v476_v34 = vadd.f32 %v474_v33, %v466_v32  ;;  %v645_v33 = vld [vmem:[%s1038_s5 + $0x18] sm:$0xff] }
 0xd65   :  { %662 = vmatpush.msra.mxu1 %v645_v33 }
 0xd66   :  { %786 = vtanh.f32 %v476_v34 }
 0xd6c   :  { %v787_v35 = vpop.eup %786 }
 0xd6d   :  { %479 = vrot.lane.b32.xlu1 %v787_v35, %s904_s23  ;;  %v643_v35 = vld [vmem:[%s1038_s5 + $0x8] sm:$0xff] }
 0xddf   :  { %v480_v36 = vpop.permute.xlu1 %479 }
 0xde0   :  { %v482_v37 = vmul.f32 %v480_v36, %v462_v27  ;;  %v613_v27 = vld [vmem:[#allocation7 + $0x10] sm:$0xff]  ;;  %v642_v36 = vld [vmem:[%s1038_s5] sm:$0xff] }
 0xde1   :  { %634 = vmatpush.msra.mxu0 %v613_v27 }
 0xde2   :  { %484 = vrot.lane.b32.xlu2 %v482_v37, %s905_s24  ;;  %v615_v37 = vld [vmem:[%s1037_s4] sm:$0x1]  ;;  %s906_s4 = smov [#allocation9]  }
 0xde3   :  { %635 = vmatpush.msra.mxu0 %v612_v28 }
 0xde5   :  { %636 = vmatpush.msra.mxu0 %v611_v29 }
 0xe3c   :  { %v485_v38 = vpop.permute.xlu2 %484 }
 0xe3d   :  { %735 = vmatmul.msk.f32.vlgmr.msrb.gmra.mxu2 %vm100_vm4, %v485_v38 }
 0xec0   :  { %v505_v40 = vpop.f32.mrf.mxu2 }
 0xec1   :  { %v508_v41 = vadd.f32 %v505_v40, %v92_v39 }
 0xec3   :  { %v736_v42 = vmul.f32 -1.442695, %v508_v41  ;;  %v646_v41 = vld [vmem:[%s1039_s6] sm:$0x1] }
 0xec5   :  { %788 = vpow2.f32 %v736_v42 }
 0xecb   :  { %v789_v43 = vpop.eup %788 }
 0xecc   :  { %v512_v44 = vadd.f32 1.0, %v789_v43 }
 0xece   :  { %790 = vrcp.f32 %v512_v44  ;;  %v524_v48 = vand.u32 2147483648, %v512_v44  ;;  %v522_v50 = vand.u32 2147483647, %v512_v44  ;;  %vm518_vm11 = vweird.f32 %v512_v44 }
 0xed0   :  { %v525_v52 = vor.u32 1.1754944e-38, %v524_v48  ;;  %vm523_vm13 = vcmp.eq.f32.partialorder %v522_v50, 8.507059e+37 }
 0xed4   :  { %v791_v45 = vpop.eup %790 }
 0xed5   :  { %v514_v46 = vmul.f32 %v791_v45, %v512_v44  ;;  %vm519_vm10 = vweird.f32 %v791_v45 }
 0xed6   :  { %vm520_vm12 = vmor %vm518_vm11, %vm519_vm10 }
 0xed7   :  { %v515_v47 = vsub.f32 1.0, %v514_v46 }
 0xed9   :  { %v516_v49 = vmul.f32 %v791_v45, %v515_v47 }
 0xedb   :  { %v517_v51 = vadd.f32 %v791_v45, %v516_v49 }
 0xedd   :  { %v521_v53 = vsel %vm520_vm12, %v791_v45, %v517_v51 }
 0xede   :  { %v526_v54 = vsel %vm523_vm13, %v525_v52, %v521_v53 }
 0xedf   :  { %v528_v55 = vmul.f32 2.0, %v526_v54  ;;  %v530_v59 = vmul.f32 %v526_v54, %v476_v34  ;;  %v644_v34 = vld [vmem:[%s1038_s5 + $0x10] sm:$0xff]  ;;  %s689_s5 = sshll.u32 %s906_s4, 4  ;;  %s690_s5 = int_to_ptr.vmem [resolvable:$true] %s689_s5 }
 0xee0   :  { %663 = vmatpush.msra.mxu1 %v644_v34 }
 0xee1   :  { %v737_v56 = vadd.f32 -1.0, %v528_v55 }
 0xee2   :  { %664 = vmatpush.msra.mxu1 %v643_v35 }
 0xee3   :  { %532 = vrot.lane.b32.xlu0 %v737_v56, %s904_s23 }
 0xee4   :  { %665 = vmatpush.msra.mxu1 %v642_v36 }
 0xf55   :  { %v533_v57 = vpop.permute.xlu0 %532 }
 0xf56   :  { %v535_v58 = vmul.f32 %v533_v57, %v526_v54 }
 0xf58   :  { %537 = vrot.lane.b32.xlu1 %v535_v58, %s905_s24 }
 0xfca   :  { %v538_v60 = vpop.permute.xlu1 %537 }
 0xfcb   :  { %v540_v61 = vadd.f32 %v538_v60, %v530_v59 }
 0xfcd   :  { %792 = vtanh.f32 %v540_v61 }
 0xfd3   :  { %v793_v62 = vpop.eup %792 }
 0xfd4   :  { %543 = vrot.lane.b32.xlu2 %v793_v62, %s904_s23 }
0x102e   :  { %v544_v63 = vpop.permute.xlu2 %543 }
0x102f   :  { %v546_v0 = vmul.f32 %v544_v63, %v526_v54 }
0x1031   :  { %548 = vrot.lane.b32.xlu0 %v546_v0, %s905_s24 }
0x10a3   :  { %v549_v1 = vpop.permute.xlu0 %548 }
0x10a4   :  { %738 = vmatmul.msk.f32.vlgmr.msrb.gmra.mxu3 %vm100_vm4, %v549_v1 }
0x1127   :  { %v569_v3 = vpop.f32.mrf.mxu3 }
0x1128   :  { %v572_v4 = vadd.f32 %v569_v3, %v95_v2 }
0x112a   :  { %v739_v5 = vmul.f32 -1.442695, %v572_v4 }
0x112c   :  { %794 = vpow2.f32 %v739_v5 }
0x1132   :  { %v795_v6 = vpop.eup %794 }
0x1133   :  { %v576_v7 = vadd.f32 1.0, %v795_v6 }
0x1135   :  { %796 = vrcp.f32 %v576_v7  ;;  %v588_v11 = vand.u32 2147483648, %v576_v7  ;;  %v586_v13 = vand.u32 2147483647, %v576_v7  ;;  %vm582_vm15 = vweird.f32 %v576_v7 }
0x1137   :  { %v589_v15 = vor.u32 1.1754944e-38, %v588_v11  ;;  %vm587_vm1 = vcmp.eq.f32.partialorder %v586_v13, 8.507059e+37 }
0x113b   :  { %v797_v8 = vpop.eup %796 }
0x113c   :  { %v578_v9 = vmul.f32 %v797_v8, %v576_v7  ;;  %vm583_vm14 = vweird.f32 %v797_v8 }
0x113d   :  { %vm584_vm0 = vmor %vm582_vm15, %vm583_vm14 }
0x113e   :  { %v579_v10 = vsub.f32 1.0, %v578_v9 }
0x1140   :  { %v580_v12 = vmul.f32 %v797_v8, %v579_v10 }
0x1142   :  { %v581_v14 = vadd.f32 %v797_v8, %v580_v12 }
0x1144   :  { %v585_v16 = vsel %vm584_vm0, %v797_v8, %v581_v14 }
0x1145   :  { %v590_v17 = vsel %vm587_vm1, %v589_v15, %v585_v16 }
0x1146   :  { %v592_v18 = vmul.f32 2.0, %v590_v17  ;;  %v594_v22 = vmul.f32 %v590_v17, %v540_v61 }
0x1148   :  { %v740_v19 = vadd.f32 -1.0, %v592_v18 }
0x114a   :  { %596 = vrot.lane.b32.xlu1 %v740_v19, %s904_s23 }
0x11bc   :  { %v597_v20 = vpop.permute.xlu1 %596 }
0x11bd   :  { %v599_v21 = vmul.f32 %v597_v20, %v590_v17 }
0x11bf   :  { %601 = vrot.lane.b32.xlu2 %v599_v21, %s905_s24 }
0x1219   :  { %v602_v23 = vpop.permute.xlu2 %601 }
0x121a   :  { %v604_v24 = vadd.f32 %v602_v23, %v594_v22 }
0x121c   :  { %798 = vtanh.f32 %v604_v24 }
0x1222   :  { %v799_v25 = vpop.eup %798 }
0x1223   :  { %607 = vrot.lane.b32.xlu0 %v799_v25, %s904_s23 }
0x1295   :  { %v608_v30 = vpop.permute.xlu0 %607 }
0x1296   :  { %v610_v31 = vmul.f32 %v608_v30, %v590_v17 }
0x1298   :  { %617 = vrot.lane.b32.xlu1 %v610_v31, %s905_s24 }
0x130a   :  { %v618_v32 = vpop.permute.xlu1 %617 }
0x130b   :  { %741 = vmatmul.msk.f32.vlgmr.msra.gmra.mxu0 %vm100_vm4, %v618_v32 }
0x1388   :  { %v638_v38 = vpop.f32.mrf.mxu0 }
0x1389   :  { %v639_v39 = vadd.f32 %v638_v38, %v615_v37 }
0x138b   :  { %800 = vtanh.f32 %v639_v39 }
0x1391   :  { %v801_v40 = vpop.eup %800 }
0x1392   :  { %742 = vmatmul.msk.f32.vlgmr.msra.gmra.mxu1 %vm100_vm4, %v801_v40 }
0x140f   :  { %v667_v42 = vpop.f32.mrf.mxu1 }
0x1410   :  { %v668_v43 = vadd.f32 %v667_v42, %v646_v41 }
0x1412   :  { %v671_v44 = vsel %vm670_vm2, %v668_v43, -inf }
0x1413   :  { %672 = vmax.xlane.f32.xlu2 %v671_v44 }
0x1486   :  { %v673_v45 = vpop.xlane.xlu2 %672 }
0x1487   :  { %v674_v46 = vsub.f32 %v668_v43, %v673_v45 }
0x1489   :  { %v675_v47 = vmul.f32 1.442695, %v674_v46 }
0x148b   :  { %802 = vpow2.f32 %v675_v47 }
0x1491   :  { %v803_v48 = vpop.eup %802 }
0x1492   :  { %v677_v49 = vsel %vm670_vm2, %v803_v48, 0.0 }
0x1493   :  { %678 = vadd.xlane.f32.xlu0 %v677_v49 }
0x1506   :  { %v679_v50 = vpop.xlane.xlu0 %678 }
0x1507   :  { %804 = vlog2.f32 %v679_v50 }
0x150d   :  { %v805_v51 = vpop.eup %804 }
0x150e   :  { %v681_v52 = vmul.f32 0.6931472, %v805_v51 }
0x1510   :  { %v682_v53 = vsub.f32 %v674_v46, %v681_v52 }
0x1512   :  { %683 = vst.msk [vmem:[#allocation9] sm:$0x1] %vm670_vm2, %v682_v53 }
0x1513   :  { %694 = dma.vmem_to_hbm [thread:$0]  %s690_s5, 16, %s692_s25, [#allocation4]  }
0x1514   :  { %896 = dma.done.wait [#allocation4], 16  }
0x1515   :  { %897 = vsyncadd [#allocation4], 4294967280 }
0x1516   :  { %699 = vsyncpa [#allocation3], 1 }
0x1517   :  { %700 = vsyncpa [#allocation8], 1 }
0x1518   :  { %701 = vsyncpa [#allocation4], 1 }
0x1519   :  { %702 = vsyncpa [#allocation5], 1 }

</bundles_post_ra>
